<compile_context>
chip_gen: v7x
topology: tpu7x:2x2x1
jax: 0.10.0
libtpu: 0.0.40
codegen_flags: <defaults>
</compile_context>

<pallas_src>
import functools
import math

import jax
import jax.numpy as jnp
from jax.experimental import pallas as pl
from jax.experimental.pallas import tpu as pltpu


def _instance_norm_kernel(x_ref, gamma_ref, beta_ref, o_ref, *, eps, n_spatial):
    # x_ref block: (1, N, TC).  Stats over the spatial (sublane) axis.
    x = x_ref[0].astype(jnp.float32)                        # (N, TC)
    mean = jnp.mean(x, axis=0, keepdims=True)               # (1, TC)  XLU reduce
    xc = x - mean
    # torch.var default is unbiased: divide by (N - 1).
    var = jnp.sum(xc * xc, axis=0, keepdims=True) * (1.0 / (n_spatial - 1))
    inv = jax.lax.rsqrt(var + eps)                          # EUP rsqrt (free slot)
    scale = inv * gamma_ref[...]                            # fold affine into scale
    o_ref[0] = (xc * scale + beta_ref[...]).astype(o_ref.dtype)


def instance_norm(x, weight=None, bias=None, eps=1e-6):
    """Channels-last InstanceNorm over all non-batch, non-channel dims."""
    shape = x.shape
    B, C = shape[0], shape[-1]
    N = math.prod(shape[1:-1])                 # spatial positions per batch
    xr = x.reshape(B, N, C)

    # Channel tile: 128 lanes when C allows it, otherwise the full channel
    # extent (BlockSpec last dim must be a 128-multiple or the full dim).
    TC = 128 if C % 128 == 0 else C

    # Params are tiny and resident in VMEM for the whole grid; pre-cast to
    # f32 in the wrapper so no per-tile casts run inside the kernel body.
    gamma = (jnp.ones((C,), jnp.float32) if weight is None
             else weight.astype(jnp.float32)).reshape(1, C)
    beta = (jnp.zeros((C,), jnp.float32) if bias is None
            else bias.astype(jnp.float32)).reshape(1, C)

    kernel = functools.partial(_instance_norm_kernel, eps=float(eps), n_spatial=N)

    out = pl.pallas_call(
        kernel,
        out_shape=jax.ShapeDtypeStruct((B, N, C), x.dtype),
        grid=(B, C // TC),
        in_specs=[
            pl.BlockSpec((1, N, TC), lambda b, c: (b, 0, c)),   # activations
            pl.BlockSpec((1, TC), lambda b, c: (0, c)),         # gamma (resident)
            pl.BlockSpec((1, TC), lambda b, c: (0, c)),         # beta  (resident)
        ],
        out_specs=pl.BlockSpec((1, N, TC), lambda b, c: (b, 0, c)),
        compiler_params=pltpu.CompilerParams(
            dimension_semantics=("parallel", "parallel")),
    )(xr, gamma, beta)
    return out.reshape(shape)


if __name__ == "__main__":
    # Small channels-last example: batch=2, spatial 8x16, channels=32.
    B, H, W, C = 2, 8, 16, 32
    key = jax.random.PRNGKey(0)
    x = jax.random.normal(key, (B, H, W, C), dtype=jnp.float32)

    # affine=False (module default).
    out = jax.block_until_ready(instance_norm(x, eps=1e-6))

    # Pure-JAX reference mirroring the PyTorch forward (unbiased variance).
    xr = x.reshape(B, H * W, C).astype(jnp.float32)
    mean = jnp.mean(xr, axis=1, keepdims=True)
    var = jnp.var(xr, axis=1, keepdims=True, ddof=1)
    ref = ((xr - mean) / jnp.sqrt(var + 1e-6)).reshape(B, H, W, C)

    assert out.shape == x.shape
    assert jnp.allclose(out, ref, atol=1e-4, rtol=1e-4), "mismatch (affine=False)"

    # affine=True path exercised with deterministic weight/bias.
    w = jnp.linspace(0.5, 1.5, C, dtype=jnp.float32)
    b = jnp.linspace(-0.1, 0.1, C, dtype=jnp.float32)
    out_aff = jax.block_until_ready(instance_norm(x, weight=w, bias=b, eps=1e-6))
    ref_aff = (ref.reshape(B, H * W, C) * w + b).reshape(B, H, W, C)
    assert jnp.allclose(out_aff, ref_aff, atol=1e-4, rtol=1e-4), "mismatch (affine=True)"

    print("KERNEL_OK")
</pallas_src>

<mosaic_0001>
module attributes {stable_mosaic.version = 11 : i64} {
  func.func @_instance_norm_kernel(%arg0: i32, %arg1: i32, %arg2: memref<1x128x32xf32, #tpu.memory_space<vmem>>, %arg3: memref<1x32xf32, #tpu.memory_space<vmem>>, %arg4: memref<1x32xf32, #tpu.memory_space<vmem>>, %arg5: memref<1x128x32xf32, #tpu.memory_space<vmem>>) attributes {dimension_semantics = [#tpu.dimension_semantics<parallel>, #tpu.dimension_semantics<parallel>], iteration_bounds = array<i64: 2, 1>, scalar_prefetch = 0 : i64, scratch_operands = 0 : i64, tpu.core_type = #tpu.core_type<tc>, window_params = [{transform_indices = @transform_0, window_bounds = array<i64: 1, 128, 32>}, {transform_indices = @transform_1, window_bounds = array<i64: 1, 32>}, {transform_indices = @transform_2, window_bounds = array<i64: 1, 32>}, {transform_indices = @transform_3, window_bounds = array<i64: 1, 128, 32>}]} {
    %c0 = arith.constant 0 : index
    %c0_0 = arith.constant 0 : index
    %c0_1 = arith.constant 0 : index
    %0 = vector.load %arg2[%c0, %c0_0, %c0_1] : memref<1x128x32xf32, #tpu.memory_space<vmem>>, vector<1x128x32xf32>
    %1 = vector.shape_cast %0 : vector<1x128x32xf32> to vector<128x32xf32>
    %cst = arith.constant dense<0.000000e+00> : vector<32xf32>
    %2 = vector.multi_reduction <add>, %1, %cst [0] : vector<128x32xf32> to vector<32xf32>
    %3 = vector.shape_cast %2 : vector<32xf32> to vector<1x32xf32>
    %cst_2 = arith.constant 1.280000e+02 : f32
    %4 = vector.broadcast %cst_2 : f32 to vector<1x32xf32>
    %5 = arith.divf %3, %4 : vector<1x32xf32>
    %6 = vector.broadcast %5 : vector<1x32xf32> to vector<128x32xf32>
    %7 = arith.subf %1, %6 : vector<128x32xf32>
    %8 = arith.mulf %7, %7 : vector<128x32xf32>
    %cst_3 = arith.constant dense<0.000000e+00> : vector<32xf32>
    %9 = vector.multi_reduction <add>, %8, %cst_3 [0] : vector<128x32xf32> to vector<32xf32>
    %10 = vector.shape_cast %9 : vector<32xf32> to vector<1x32xf32>
    %cst_4 = arith.constant 0.00787401571 : f32
    %11 = vector.broadcast %cst_4 : f32 to vector<1x32xf32>
    %12 = arith.mulf %10, %11 : vector<1x32xf32>
    %cst_5 = arith.constant 9.99999997E-7 : f32
    %13 = vector.broadcast %cst_5 : f32 to vector<1x32xf32>
    %14 = arith.addf %12, %13 : vector<1x32xf32>
    %15 = math.rsqrt %14 : vector<1x32xf32>
    %c0_6 = arith.constant 0 : index
    %c0_7 = arith.constant 0 : index
    %16 = vector.load %arg3[%c0_6, %c0_7] : memref<1x32xf32, #tpu.memory_space<vmem>>, vector<1x32xf32>
    %17 = arith.mulf %15, %16 : vector<1x32xf32>
    %18 = vector.broadcast %17 : vector<1x32xf32> to vector<128x32xf32>
    %19 = arith.mulf %7, %18 : vector<128x32xf32>
    %c0_8 = arith.constant 0 : index
    %c0_9 = arith.constant 0 : index
    %20 = vector.load %arg4[%c0_8, %c0_9] : memref<1x32xf32, #tpu.memory_space<vmem>>, vector<1x32xf32>
    %21 = vector.broadcast %20 : vector<1x32xf32> to vector<128x32xf32>
    %22 = arith.addf %19, %21 : vector<128x32xf32>
    %c0_10 = arith.constant 0 : index
    %c0_11 = arith.constant 0 : index
    %c0_12 = arith.constant 0 : index
    %23 = vector.load %arg5[%c0_10, %c0_11, %c0_12] : memref<1x128x32xf32, #tpu.memory_space<vmem>>, vector<1x128x32xf32>
    %24 = vector.shape_cast %23 : vector<1x128x32xf32> to vector<128x32xf32>
    %25 = vector.shape_cast %22 : vector<128x32xf32> to vector<1x128x32xf32>
    tpu.vector_store %arg5[%c0_10, %c0_11, %c0_12], %25 {strides = array<i32>} : memref<1x128x32xf32, #tpu.memory_space<vmem>>, vector<1x128x32xf32>,
    return
  }
  func.func @transform_0(%arg0: i32, %arg1: i32) -> (i32, i32, i32) {
    %c0_i32 = arith.constant 0 : i32
    %c0_i32_0 = arith.constant 0 : i32
    return %arg0, %c0_i32, %arg1 : i32, i32, i32
  }
  func.func @transform_1(%arg0: i32, %arg1: i32) -> (i32, i32) {
    %c0_i32 = arith.constant 0 : i32
    %c0_i32_0 = arith.constant 0 : i32
    return %c0_i32, %arg1 : i32, i32
  }
  func.func @transform_2(%arg0: i32, %arg1: i32) -> (i32, i32) {
    %c0_i32 = arith.constant 0 : i32
    %c0_i32_0 = arith.constant 0 : i32
    return %c0_i32, %arg1 : i32, i32
  }
  func.func @transform_3(%arg0: i32, %arg1: i32) -> (i32, i32, i32) {
    %c0_i32 = arith.constant 0 : i32
    %c0_i32_0 = arith.constant 0 : i32
    return %arg0, %c0_i32, %arg1 : i32, i32, i32
  }
}

</mosaic_0001>

<bundles_post_ra>
// kernel: tpu_custom_call.1
= control target key start
LH: loop header
LB: loop body
LE: loop exit
PB: predicated region body
PF: predicated region fallthrough
CT: control target
= control target key end

     0   :  { %s613_s12 = smov 0   ;;  %s615_s13 = smov 0   ;;  %s823_s0 = inlined_call_operand.vmem [shape: f32[2,128,32], index: 0, kind: input, shape index: {}]   ;;  %s824_s1 = inlined_call_operand.vmem [shape: f32[1,32], index: 1, kind: input, shape index: {}]   ;;  %s825_s2 = inlined_call_operand.vmem [shape: f32[1,32], index: 2, kind: input, shape index: {}]   ;;  %s826_s3 = inlined_call_operand.vmem [shape: f32[2,128,32], index: 3, kind: output, shape index: {}]  }
   0x1   :  { %s617_s14 = smov 0  }
   0x2 LB: > { %s25_s15 = sadd.s32 1, %s587_s13  ;;  %p533_p0 = scmp.ge.s32.totalorder %s591_s14, 1  ;;  %s591_s14 = sphi %s617_s14, %s13_s14   ;;  %s587_s13 = sphi %s615_s13, %s828_s13   ;;  %s583_s12 = sphi %s613_s12, %s827_s12  }
   0x3   : > { %p27_p1 = scmp.ge.s32.totalorder %s25_s15, 2  ;;  %p172_p2 = scmp.lt.s32.totalorder %s591_s14, 3 }
   0x5   : > { %s830_s15 = smov (%p27_p1, %s25_s15), 0  ;;  %p173_p3 = pnand %p533_p0, %p172_p2 }
   0x6   : > { %p208_p4 = scmp.lt.s32.totalorder (!%p173_p3), %s583_s12, 1  ;;  %vm246_vm0 = vcmask (!%p173_p3), 261120  }
   0x7   : > { %176 = sbr.rel (%p173_p3) target bundleno = 142 (0x8e), region = 32 }
   0xe   : > { %s832_s12 = smov (!%p208_p4, %s583_s12), 1 }
   0xf   : > { %s541_s16 = sshll.u32 %s832_s12, 7 }
  0x10   : > { %s639_s19 = scalar_lea.vmem %s823_s0, %s541_s16  ;;  %s768_s26 = scalar_lea.vmem %s826_s3, %s541_s16 }
  0x11   : > { %v230_v0 = vld [vmem:[%s639_s19] sm:$0xff]  ;;  %v231_v1 = vld [vmem:[%s639_s19 + $0x8] sm:$0xff]  ;;  %v232_v2 = vld [vmem:[%s639_s19 + $0x10] sm:$0xff] }
  0x12   : > { %v233_v3 = vld [vmem:[%s639_s19 + $0x18] sm:$0xff]  ;;  %v247_v4 = vsel %vm246_vm0, %v230_v0, 0.0  ;;  %v248_v5 = vsel %vm246_vm0, %v231_v1, 0.0  ;;  %v250_v6 = vsel %vm246_vm0, %v232_v2, 0.0  ;;  %v234_v7 = vld [vmem:[%s639_s19 + $0x20] sm:$0xff]  ;;  %v235_v10 = vld [vmem:[%s639_s19 + $0x28] sm:$0xff] }
  0x13   : > { %v249_v8 = vadd.f32 %v248_v5, %v247_v4  ;;  %v252_v9 = vsel %vm246_vm0, %v233_v3, 0.0  ;;  %v254_v12 = vsel %vm246_vm0, %v234_v7, 0.0  ;;  %v236_v13 = vld [vmem:[%s639_s19 + $0x30] sm:$0xff]  ;;  %v256_v15 = vsel %vm246_vm0, %v235_v10, 0.0  ;;  %v237_v16 = vld [vmem:[%s639_s19 + $0x38] sm:$0xff]  ;;  %v238_v19 = vld [vmem:[%s639_s19 + $0x40] sm:$0xff] }
  0x14   : > { %v258_v18 = vsel %vm246_vm0, %v236_v13, 0.0  ;;  %v260_v21 = vsel %vm246_vm0, %v237_v16, 0.0  ;;  %v239_v22 = vld [vmem:[%s639_s19 + $0x48] sm:$0xff]  ;;  %v262_v24 = vsel %vm246_vm0, %v238_v19, 0.0  ;;  %v240_v25 = vld [vmem:[%s639_s19 + $0x50] sm:$0xff]  ;;  %v241_v28 = vld [vmem:[%s639_s19 + $0x58] sm:$0xff] }
  0x15   : > { %v251_v11 = vadd.f32 %v250_v6, %v249_v8  ;;  %v264_v27 = vsel %vm246_vm0, %v239_v22, 0.0  ;;  %v266_v30 = vsel %vm246_vm0, %v240_v25, 0.0  ;;  %v242_v31 = vld [vmem:[%s639_s19 + $0x60] sm:$0xff]  ;;  %v268_v33 = vsel %vm246_vm0, %v241_v28, 0.0  ;;  %v243_v34 = vld [vmem:[%s639_s19 + $0x68] sm:$0xff]  ;;  %v244_v37 = vld [vmem:[%s639_s19 + $0x70] sm:$0xff] }
  0x16   : > { %v270_v36 = vsel %vm246_vm0, %v242_v31, 0.0  ;;  %v272_v39 = vsel %vm246_vm0, %v243_v34, 0.0  ;;  %v245_v40 = vld [vmem:[%s639_s19 + $0x78] sm:$0xff]  ;;  %v274_v42 = vsel %vm246_vm0, %v244_v37, 0.0 }
  0x17   : > { %v253_v14 = vadd.f32 %v252_v9, %v251_v11  ;;  %v276_v44 = vsel %vm246_vm0, %v245_v40, 0.0 }
  0x19   : > { %v255_v17 = vadd.f32 %v254_v12, %v253_v14 }
  0x1b   : > { %v257_v20 = vadd.f32 %v256_v15, %v255_v17 }
  0x1d   : > { %v259_v23 = vadd.f32 %v258_v18, %v257_v20 }
  0x1f   : > { %v261_v26 = vadd.f32 %v260_v21, %v259_v23 }
  0x21   : > { %v263_v29 = vadd.f32 %v262_v24, %v261_v26 }
  0x23   : > { %v265_v32 = vadd.f32 %v264_v27, %v263_v29 }
  0x25   : > { %v267_v35 = vadd.f32 %v266_v30, %v265_v32 }
  0x27   : > { %v269_v38 = vadd.f32 %v268_v33, %v267_v35 }
  0x29   : > { %v271_v41 = vadd.f32 %v270_v36, %v269_v38 }
  0x2b   : > { %v273_v43 = vadd.f32 %v272_v39, %v271_v41 }
  0x2d   : > { %v275_v45 = vadd.f32 %v274_v42, %v273_v43 }
  0x2f   : > { %v277_v46 = vadd.f32 %v276_v44, %v275_v45 }
  0x31   : > { %v278_v47 = vrot.slane %v277_v46, 4 }
  0x33   : > { %v279_v48 = vadd.f32 %v278_v47, %v277_v46 }
  0x35   : > { %v280_v49 = vrot.slane %v279_v48, 2 }
  0x37   : > { %v281_v50 = vadd.f32 %v280_v49, %v279_v48 }
  0x39   : > { %v282_v51 = vrot.slane %v281_v50, 1 }
  0x3b   : > { %v283_v52 = vadd.f32 %v282_v51, %v281_v50 }
  0x3d   : > { %v285_v53 = vmul.f32 0.0078125, %v283_v52 }
  0x3f   : > { %v673_v54 = vsub.f32 %v230_v0, %v285_v53  ;;  %v675_v55 = vsub.f32 %v231_v1, %v285_v53  ;;  %v677_v56 = vsub.f32 %v232_v2, %v285_v53  ;;  %v679_v57 = vsub.f32 %v233_v3, %v285_v53 }
  0x40   : > { %v681_v58 = vsub.f32 %v234_v7, %v285_v53  ;;  %v689_v62 = vsub.f32 %v235_v10, %v285_v53  ;;  %v693_v0 = vsub.f32 %v236_v13, %v285_v53  ;;  %v700_v6 = vsub.f32 %v237_v16, %v285_v53 }
  0x41   : > { %v302_v59 = vmul.f32 %v673_v54, %v673_v54  ;;  %v303_v60 = vmul.f32 %v675_v55, %v675_v55  ;;  %v304_v61 = vmul.f32 %v677_v56, %v677_v56  ;;  %v305_v63 = vmul.f32 %v679_v57, %v679_v57 }
  0x42   : > { %v306_v1 = vmul.f32 %v681_v58, %v681_v58  ;;  %v307_v7 = vmul.f32 %v689_v62, %v689_v62  ;;  %v705_v10 = vsub.f32 %v238_v19, %v285_v53  ;;  %v308_v11 = vmul.f32 %v693_v0, %v693_v0 }
  0x43   : > { %v318_v2 = vsel %vm246_vm0, %v302_v59, 0.0  ;;  %v319_v3 = vsel %vm246_vm0, %v303_v60, 0.0  ;;  %v321_v4 = vsel %vm246_vm0, %v304_v61, 0.0  ;;  %v323_v8 = vsel %vm246_vm0, %v305_v63, 0.0 }
  0x44   : > { %v320_v5 = vadd.f32 %v319_v3, %v318_v2  ;;  %v325_v12 = vsel %vm246_vm0, %v306_v1, 0.0  ;;  %v710_v14 = vsub.f32 %v239_v22, %v285_v53  ;;  %v309_v15 = vmul.f32 %v700_v6, %v700_v6 }
  0x45   : > { %v327_v16 = vsel %vm246_vm0, %v307_v7, 0.0  ;;  %v715_v18 = vsub.f32 %v240_v25, %v285_v53  ;;  %v310_v19 = vmul.f32 %v705_v10, %v705_v10  ;;  %v329_v20 = vsel %vm246_vm0, %v308_v11, 0.0  ;;  %v358_v7 = vld [vmem:[%s824_s1] sm:$0x1] }
  0x46   : > { %v322_v9 = vadd.f32 %v321_v4, %v320_v5  ;;  %v720_v23 = vsub.f32 %v241_v28, %v285_v53  ;;  %v311_v22 = vmul.f32 %v710_v14, %v710_v14  ;;  %v331_v24 = vsel %vm246_vm0, %v309_v15, 0.0 }
  0x47   : > { %v725_v27 = vsub.f32 %v242_v31, %v285_v53  ;;  %v312_v25 = vmul.f32 %v715_v18, %v715_v18  ;;  %v333_v29 = vsel %vm246_vm0, %v310_v19, 0.0  ;;  %v730_v32 = vsub.f32 %v243_v34, %v285_v53 }
  0x48   : > { %v324_v13 = vadd.f32 %v323_v8, %v322_v9  ;;  %v313_v28 = vmul.f32 %v720_v23, %v720_v23  ;;  %v335_v33 = vsel %vm246_vm0, %v311_v22, 0.0  ;;  %v735_v36 = vsub.f32 %v244_v37, %v285_v53 }
  0x49   : > { %v314_v31 = vmul.f32 %v725_v27, %v725_v27  ;;  %v337_v38 = vsel %vm246_vm0, %v312_v25, 0.0  ;;  %v740_v41 = vsub.f32 %v245_v40, %v285_v53  ;;  %v315_v34 = vmul.f32 %v730_v32, %v730_v32 }
  0x4a   : > { %v326_v17 = vadd.f32 %v325_v12, %v324_v13  ;;  %v339_v42 = vsel %vm246_vm0, %v313_v28, 0.0  ;;  %v316_v44 = vmul.f32 %v735_v36, %v735_v36  ;;  %v360_v4 = vlaneseq  ;;  %v538_v13 = vld [vmem:[%s825_s2] ss:$0 sm:$0xff] }
  0x4b   : > { %v341_v37 = vsel %vm246_vm0, %v314_v31, 0.0  ;;  %v317_v46 = vmul.f32 %v740_v41, %v740_v41  ;;  %v343_v47 = vsel %vm246_vm0, %v315_v34, 0.0 }
  0x4c   : > { %v328_v21 = vadd.f32 %v327_v16, %v326_v17  ;;  %v345_v40 = vsel %vm246_vm0, %v316_v44, 0.0  ;;  %v361_v5 = vshrl.u32 %v360_v4, 7 }
  0x4d   : > { %v347_v50 = vsel %vm246_vm0, %v317_v46, 0.0 }
  0x4e   : > { %v330_v26 = vadd.f32 %v329_v20, %v328_v21  ;;  %v362_v8 = vsub.s32 0, %v361_v5 }
  0x50   : > { %v332_v30 = vadd.f32 %v331_v24, %v330_v26 }
  0x52   : > { %v334_v35 = vadd.f32 %v333_v29, %v332_v30 }
  0x54   : > { %v336_v39 = vadd.f32 %v335_v33, %v334_v35 }
  0x56   : > { %v338_v43 = vadd.f32 %v337_v38, %v336_v39 }
  0x58   : > { %v340_v45 = vadd.f32 %v339_v42, %v338_v43 }
  0x5a   : > { %v342_v48 = vadd.f32 %v341_v37, %v340_v45 }
  0x5c   : > { %v344_v49 = vadd.f32 %v343_v47, %v342_v48 }
  0x5e   : > { %v346_v51 = vadd.f32 %v345_v40, %v344_v49 }
  0x60   : > { %v348_v52 = vadd.f32 %v347_v50, %v346_v51 }
  0x62   : > { %v349_v53 = vrot.slane %v348_v52, 4 }
  0x64   : > { %v350_v59 = vadd.f32 %v349_v53, %v348_v52 }
  0x66   : > { %v351_v60 = vrot.slane %v350_v59, 2 }
  0x68   : > { %v352_v61 = vadd.f32 %v351_v60, %v350_v59 }
  0x6a   : > { %v353_v63 = vrot.slane %v352_v61, 1 }
  0x6c   : > { %v354_v1 = vadd.f32 %v353_v63, %v352_v61 }
  0x6e   : > { %v355_v2 = vmul.f32 0.007874016, %v354_v1 }
  0x70   : > { %v356_v3 = vadd.f32 1e-06, %v355_v2 }
  0x72   : > { %567 = vrsqrt.f32 %v356_v3 }
  0x7c   : > { %v568_v9 = vpop.eup %567 }
  0x7d   : > { %v359_v11 = vmul.f32 %v568_v9, %v358_v7 }
  0x7f   : > { %v363_v12 = vrot.slane %v359_v11, %v362_v8 }
  0x81   : > { %v364_v15 = vmul.f32 %v363_v12, %v673_v54  ;;  %v365_v16 = vmul.f32 %v363_v12, %v675_v55  ;;  %v366_v17 = vmul.f32 %v363_v12, %v677_v56  ;;  %v367_v19 = vmul.f32 %v363_v12, %v679_v57 }
  0x82   : > { %v368_v20 = vmul.f32 %v363_v12, %v681_v58  ;;  %v369_v54 = vmul.f32 %v363_v12, %v689_v62  ;;  %v370_v55 = vmul.f32 %v363_v12, %v693_v0  ;;  %v371_v56 = vmul.f32 %v363_v12, %v700_v6 }
  0x83   : > { %v387_v21 = vadd.f32 %v538_v13, %v364_v15  ;;  %v388_v57 = vadd.f32 %v538_v13, %v365_v16  ;;  %v389_v22 = vadd.f32 %v538_v13, %v366_v17  ;;  %v390_v24 = vadd.f32 %v538_v13, %v367_v19 }
  0x84   : > { %v391_v26 = vadd.f32 %v538_v13, %v368_v20  ;;  %v392_v25 = vadd.f32 %v538_v13, %v369_v54  ;;  %v393_v29 = vadd.f32 %v538_v13, %v370_v55  ;;  %v394_v30 = vadd.f32 %v538_v13, %v371_v56 }
  0x85   : > { %403 = vst.msk [vmem:[%s768_s26] sm:$0xff] %vm246_vm0, %v387_v21  ;;  %404 = vst.msk [vmem:[%s768_s26 + $0x8] sm:$0xff] %vm246_vm0, %v388_v57  ;;  %v372_v58 = vmul.f32 %v363_v12, %v705_v10  ;;  %v373_v62 = vmul.f32 %v363_v12, %v710_v14  ;;  %v374_v0 = vmul.f32 %v363_v12, %v715_v18 }
  0x86   : > { %405 = vst.msk [vmem:[%s768_s26 + $0x10] sm:$0xff] %vm246_vm0, %v389_v22  ;;  %406 = vst.msk [vmem:[%s768_s26 + $0x18] sm:$0xff] %vm246_vm0, %v390_v24  ;;  %v375_v6 = vmul.f32 %v363_v12, %v720_v23  ;;  %v376_v10 = vmul.f32 %v363_v12, %v725_v27  ;;  %v377_v14 = vmul.f32 %v363_v12, %v730_v32 }
  0x87   : > { %407 = vst.msk [vmem:[%s768_s26 + $0x20] sm:$0xff] %vm246_vm0, %v391_v26  ;;  %408 = vst.msk [vmem:[%s768_s26 + $0x28] sm:$0xff] %vm246_vm0, %v392_v25  ;;  %v378_v18 = vmul.f32 %v363_v12, %v735_v36  ;;  %v379_v23 = vmul.f32 %v363_v12, %v740_v41  ;;  %v395_v28 = vadd.f32 %v538_v13, %v372_v58 }
  0x88   : > { %409 = vst.msk [vmem:[%s768_s26 + $0x30] sm:$0xff] %vm246_vm0, %v393_v29  ;;  %410 = vst.msk [vmem:[%s768_s26 + $0x38] sm:$0xff] %vm246_vm0, %v394_v30  ;;  %v396_v33 = vadd.f32 %v538_v13, %v373_v62  ;;  %v397_v35 = vadd.f32 %v538_v13, %v374_v0  ;;  %v398_v31 = vadd.f32 %v538_v13, %v375_v6 }
  0x89   : > { %v399_v38 = vadd.f32 %v538_v13, %v376_v10  ;;  %v400_v39 = vadd.f32 %v538_v13, %v377_v14  ;;  %v401_v34 = vadd.f32 %v538_v13, %v378_v18  ;;  %v402_v42 = vadd.f32 %v538_v13, %v379_v23  ;;  %411 = vst.msk [vmem:[%s768_s26 + $0x40] sm:$0xff] %vm246_vm0, %v395_v28 }
  0x8a   : > { %412 = vst.msk [vmem:[%s768_s26 + $0x48] sm:$0xff] %vm246_vm0, %v396_v33  ;;  %413 = vst.msk [vmem:[%s768_s26 + $0x50] sm:$0xff] %vm246_vm0, %v397_v35 }
  0x8b   : > { %414 = vst.msk [vmem:[%s768_s26 + $0x58] sm:$0xff] %vm246_vm0, %v398_v31  ;;  %415 = vst.msk [vmem:[%s768_s26 + $0x60] sm:$0xff] %vm246_vm0, %v399_v38 }
  0x8c   : > { %416 = vst.msk [vmem:[%s768_s26 + $0x68] sm:$0xff] %vm246_vm0, %v400_v39  ;;  %417 = vst.msk [vmem:[%s768_s26 + $0x70] sm:$0xff] %vm246_vm0, %v401_v34 }
  0x8d   : > { %418 = vst.msk [vmem:[%s768_s26 + $0x78] sm:$0xff] %vm246_vm0, %v402_v42 }
  0x8e PF: > { %s13_s14 = sadd.s32 1, %s591_s14   ;;  %s827_s12 = smov %s587_s13 }
  0x8f   : > { %p10_p5 = scmp.ge.s32.totalorder %s13_s14, 4   ;;  %s828_s13 = smov %s830_s15 }
  0x91   :  { %12 = sbr.rel (!%p10_p5) target bundleno = 2 (0x2), region = 68 }

</bundles_post_ra>
